<compile_context>
chip_gen: v7x
topology: tpu7x:2x2x1
jax: 0.10.0
libtpu: 0.0.40
codegen_flags: <defaults>
</compile_context>

<pallas_src>
import functools

import jax
import jax.numpy as jnp
from jax.experimental import pallas as pl
from jax.experimental.pallas import tpu as pltpu


_LANE = 128      # lane width: last dim of every block padded to a multiple
_SUBLANE = 8     # sublane width: row-tile size must be a multiple


def _round_up(x, m):
    return ((x + m - 1) // m) * m


def _mlp_fused_kernel(x_ref, *refs, num_layers, compute_dtype):
    """Fused MLP on one row tile.

    refs layout: w_0, b_0, w_1, b_1, ..., w_{L-1}, b_{L-1}, o_ref
      x_ref : [TM, D0_pad]        (compute_dtype)
      w_i   : [Di_pad, Di+1_pad]  (compute_dtype)
      b_i   : [1, Di+1_pad]       (float32)
      o_ref : [TM, DL_pad]
    """
    o_ref = refs[-1]
    h = x_ref[...]
    for i in range(num_layers):
        w = refs[2 * i][...]
        b = refs[2 * i + 1][...]
        # MXU matmul in compute_dtype, f32 accumulation.
        y = jnp.dot(h.astype(compute_dtype), w,
                    preferred_element_type=jnp.float32)
        y = y + b.astype(jnp.float32)          # bias + ReLU epilogue in f32
        if i < num_layers - 1:
            y = jnp.maximum(y, 0.0)
        h = y
    o_ref[...] = h.astype(o_ref.dtype)


def mlp_forward(x, weights, biases, *, compute_dtype=jnp.bfloat16,
                block_rows=512, out_dtype=None):
    """Fused MLP forward.

    x: [N, d_in]; weights[i]: [d_in_i, d_out_i] (pre-transposed vs. PyTorch
    nn.Linear, i.e. y = x @ W + b); biases[i]: [d_out_i].
    """
    num_layers = len(weights)
    out_dtype = out_dtype or x.dtype

    n, d_in = x.shape
    d_out = weights[-1].shape[1]

    # ---- pad every feature dim to a lane multiple (128): full MXU tiles,
    #      lane-dense loads/stores. Zero padding is exact (padded inputs are
    #      zero, padded weight rows/cols are zero, ReLU(0) == 0). ----
    dims = [d_in] + [w.shape[1] for w in weights]
    dims_p = [_round_up(d, _LANE) for d in dims]

    w_p, b_p = [], []
    for i, (w, b) in enumerate(zip(weights, biases)):
        wp = jnp.zeros((dims_p[i], dims_p[i + 1]), compute_dtype)
        wp = wp.at[: w.shape[0], : w.shape[1]].set(w.astype(compute_dtype))
        bp = jnp.zeros((1, dims_p[i + 1]), jnp.float32)
        bp = bp.at[0, : b.shape[0]].set(b.astype(jnp.float32))
        w_p.append(wp)
        b_p.append(bp)

    # ---- row tiling: TM up to `block_rows`, multiple of 8; pad N to a
    #      multiple of TM so the grid divides evenly. ----
    tm = min(block_rows, _round_up(n, _SUBLANE))
    n_pad = _round_up(n, tm)
    x_p = jnp.zeros((n_pad, dims_p[0]), compute_dtype)
    x_p = x_p.at[:n, :d_in].set(x.astype(compute_dtype))

    grid = (n_pad // tm,)

    in_specs = [pl.BlockSpec((tm, dims_p[0]), lambda i: (i, 0))]
    inputs = [x_p]
    for li in range(num_layers):
        in_specs.append(
            pl.BlockSpec((dims_p[li], dims_p[li + 1]), lambda i: (0, 0)))
        in_specs.append(
            pl.BlockSpec((1, dims_p[li + 1]), lambda i: (0, 0)))
        inputs.append(w_p[li])
        inputs.append(b_p[li])

    out_specs = pl.BlockSpec((tm, dims_p[-1]), lambda i: (i, 0))
    out_shape = jax.ShapeDtypeStruct((n_pad, dims_p[-1]), out_dtype)

    # ---- advisory cost estimate ----
    itemsize = jnp.dtype(compute_dtype).itemsize
    out_itemsize = jnp.dtype(out_dtype).itemsize
    flops = sum(2 * n_pad * dims_p[i] * dims_p[i + 1]
                for i in range(num_layers))
    param_bytes = (sum(w.size * itemsize for w in w_p)
                   + sum(b.size * 4 for b in b_p))
    bytes_accessed = (n_pad * dims_p[0] * itemsize
                      + n_pad * dims_p[-1] * out_itemsize
                      + param_bytes)

    # ---- explicit VMEM budget with headroom (fits v7x's 64 MiB VMEM):
    #      double-buffered x / out row tiles + resident (double-buffered)
    #      params + intermediate activations held in vregs/VMEM. ----
    act_bytes = 4 * tm * max(dims_p)  # widest f32 intermediate per tile
    vmem_need = (2 * tm * dims_p[0] * itemsize
                 + 2 * tm * dims_p[-1] * out_itemsize
                 + 2 * param_bytes
                 + 2 * act_bytes)
    vmem_limit = int(min(max(2 * vmem_need, 8 * 1024 * 1024),
                         48 * 1024 * 1024))

    kernel = functools.partial(_mlp_fused_kernel, num_layers=num_layers,
                               compute_dtype=compute_dtype)

    out = pl.pallas_call(
        kernel,
        out_shape=out_shape,
        grid=grid,
        in_specs=in_specs,
        out_specs=out_specs,
        compiler_params=pltpu.CompilerParams(
            dimension_semantics=("parallel",),
            vmem_limit_bytes=vmem_limit,
        ),
        cost_estimate=pl.CostEstimate(flops=flops, transcendentals=0,
                                      bytes_accessed=bytes_accessed),
    )(*inputs)

    # Slice off row / lane padding.
    return out[:n, :d_out]


class MLP:
    """JAX/Pallas port of the PyTorch MLP (FFN): Linear->ReLU ... ->Linear."""

    def __init__(self, input_dim, hidden_dim, output_dim, num_layers, key,
                 compute_dtype=jnp.bfloat16):
        self.num_layers = num_layers
        self.compute_dtype = compute_dtype
        h = [hidden_dim] * (num_layers - 1)
        dims = list(zip([input_dim] + h, h + [output_dim]))
        self.weights, self.biases = [], []
        for n_in, n_out in dims:
            kw, kb, key = jax.random.split(key, 3)
            bound = 1.0 / (n_in ** 0.5)  # PyTorch default fan-in bound
            w = jax.random.uniform(kw, (n_in, n_out), jnp.float32, -bound, bound)
            b = jax.random.uniform(kb, (n_out,), jnp.float32, -bound, bound)
            self.weights.append(w)
            self.biases.append(b)
        self._forward = jax.jit(
            functools.partial(mlp_forward, compute_dtype=compute_dtype))

    def __call__(self, x):
        # x: [..., input_dim] -> flatten leading dims, restore at the end.
        lead = x.shape[:-1]
        x2 = x.reshape(-1, x.shape[-1])
        out = self._forward(x2, self.weights, self.biases)
        return out.reshape(*lead, out.shape[-1])


def mlp_reference(x, weights, biases, compute_dtype=jnp.float32):
    """Pure-JAX reference with the same dtype discipline as the kernel."""
    lead = x.shape[:-1]
    h = x.reshape(-1, x.shape[-1])
    num_layers = len(weights)
    for i, (w, b) in enumerate(zip(weights, biases)):
        h = jnp.dot(h.astype(compute_dtype), w.astype(compute_dtype),
                    preferred_element_type=jnp.float32)
        h = h + b.astype(jnp.float32)
        if i < num_layers - 1:
            h = jnp.maximum(h, 0.0)
    return h.astype(x.dtype).reshape(*lead, h.shape[-1])


if __name__ == "__main__":
    key = jax.random.PRNGKey(0)
    k_in, k_model = jax.random.split(key)

    # Small shapes consistent with the module: (batch=2, seq=8, input_dim=32)
    input_dim, hidden_dim, output_dim, num_layers = 32, 64, 16, 3
    x = jax.random.normal(k_in, (2, 8, input_dim), jnp.float32)

    # 1) f32 compute path: bit-faithful to the PyTorch module's numerics.
    mlp_f32 = MLP(input_dim, hidden_dim, output_dim, num_layers, k_model,
                  compute_dtype=jnp.float32)
    out_f32 = jax.block_until_ready(mlp_f32(x))
    ref_f32 = mlp_reference(x, mlp_f32.weights, mlp_f32.biases, jnp.float32)
    assert out_f32.shape == (2, 8, output_dim)
    assert jnp.allclose(out_f32, ref_f32, atol=1e-5, rtol=1e-5)

    # 2) bf16 compute path (recommended on v6e/v7x): same weights, relaxed tol.
    mlp_bf16 = MLP(input_dim, hidden_dim, output_dim, num_layers, k_model,
                   compute_dtype=jnp.bfloat16)
    out_bf16 = jax.block_until_ready(mlp_bf16(x))
    ref_bf16 = mlp_reference(x, mlp_bf16.weights, mlp_bf16.biases, jnp.bfloat16)
    assert out_bf16.shape == (2, 8, output_dim)
    assert jnp.allclose(out_bf16, ref_bf16, atol=2e-2, rtol=2e-2)

    print("KERNEL_OK")
</pallas_src>

<mosaic_0001>
module attributes {stable_mosaic.version = 11 : i64} {
  func.func @_mlp_fused_kernel(%arg0: i32, %arg1: memref<16x128xf32, #tpu.memory_space<vmem>>, %arg2: memref<128x128xf32, #tpu.memory_space<vmem>>, %arg3: memref<1x128xf32, #tpu.memory_space<vmem>>, %arg4: memref<128x128xf32, #tpu.memory_space<vmem>>, %arg5: memref<1x128xf32, #tpu.memory_space<vmem>>, %arg6: memref<128x128xf32, #tpu.memory_space<vmem>>, %arg7: memref<1x128xf32, #tpu.memory_space<vmem>>, %arg8: memref<16x128xf32, #tpu.memory_space<vmem>>) attributes {dimension_semantics = [#tpu.dimension_semantics<parallel>], iteration_bounds = array<i64: 1>, scalar_prefetch = 0 : i64, scratch_operands = 0 : i64, tpu.core_type = #tpu.core_type<tc>, window_params = [{transform_indices = @transform_0, window_bounds = array<i64: 16, 128>}, {pipeline_mode = #tpu.pipeline_mode<synchronous>, transform_indices = @transform_1, window_bounds = array<i64: 128, 128>}, {pipeline_mode = #tpu.pipeline_mode<synchronous>, transform_indices = @transform_2, window_bounds = array<i64: 1, 128>}, {pipeline_mode = #tpu.pipeline_mode<synchronous>, transform_indices = @transform_3, window_bounds = array<i64: 128, 128>}, {pipeline_mode = #tpu.pipeline_mode<synchronous>, transform_indices = @transform_4, window_bounds = array<i64: 1, 128>}, {pipeline_mode = #tpu.pipeline_mode<synchronous>, transform_indices = @transform_5, window_bounds = array<i64: 128, 128>}, {pipeline_mode = #tpu.pipeline_mode<synchronous>, transform_indices = @transform_6, window_bounds = array<i64: 1, 128>}, {transform_indices = @transform_7, window_bounds = array<i64: 16, 128>}]} {
    %c0 = arith.constant 0 : index
    %c0_0 = arith.constant 0 : index
    %0 = vector.load %arg1[%c0, %c0_0] : memref<16x128xf32, #tpu.memory_space<vmem>>, vector<16x128xf32>
    %c0_1 = arith.constant 0 : index
    %c0_2 = arith.constant 0 : index
    %1 = vector.load %arg2[%c0_1, %c0_2] : memref<128x128xf32, #tpu.memory_space<vmem>>, vector<128x128xf32>
    %c0_3 = arith.constant 0 : index
    %c0_4 = arith.constant 0 : index
    %2 = vector.load %arg3[%c0_3, %c0_4] : memref<1x128xf32, #tpu.memory_space<vmem>>, vector<1x128xf32>
    %cst = arith.constant dense<0.000000e+00> : vector<16x128xf32>
    %3 = tpu.matmul %0, %1, %cst {dimension_numbers = #tpu.dot_dimension_numbers<[1], [0], [0], [1], [0, 0, 1, 1], [], []>} : vector<16x128xf32>, vector<128x128xf32>, vector<16x128xf32> -> vector<16x128xf32>
    %4 = vector.broadcast %2 : vector<1x128xf32> to vector<16x128xf32>
    %5 = arith.addf %3, %4 : vector<16x128xf32>
    %cst_5 = arith.constant 0.000000e+00 : f32
    %6 = vector.broadcast %cst_5 : f32 to vector<16x128xf32>
    %7 = arith.maximumf %5, %6 : vector<16x128xf32>
    %c0_6 = arith.constant 0 : index
    %c0_7 = arith.constant 0 : index
    %8 = vector.load %arg4[%c0_6, %c0_7] : memref<128x128xf32, #tpu.memory_space<vmem>>, vector<128x128xf32>
    %c0_8 = arith.constant 0 : index
    %c0_9 = arith.constant 0 : index
    %9 = vector.load %arg5[%c0_8, %c0_9] : memref<1x128xf32, #tpu.memory_space<vmem>>, vector<1x128xf32>
    %cst_10 = arith.constant dense<0.000000e+00> : vector<16x128xf32>
    %10 = tpu.matmul %7, %8, %cst_10 {dimension_numbers = #tpu.dot_dimension_numbers<[1], [0], [0], [1], [0, 0, 1, 1], [], []>} : vector<16x128xf32>, vector<128x128xf32>, vector<16x128xf32> -> vector<16x128xf32>
    %11 = vector.broadcast %9 : vector<1x128xf32> to vector<16x128xf32>
    %12 = arith.addf %10, %11 : vector<16x128xf32>
    %cst_11 = arith.constant 0.000000e+00 : f32
    %13 = vector.broadcast %cst_11 : f32 to vector<16x128xf32>
    %14 = arith.maximumf %12, %13 : vector<16x128xf32>
    %c0_12 = arith.constant 0 : index
    %c0_13 = arith.constant 0 : index
    %15 = vector.load %arg6[%c0_12, %c0_13] : memref<128x128xf32, #tpu.memory_space<vmem>>, vector<128x128xf32>
    %c0_14 = arith.constant 0 : index
    %c0_15 = arith.constant 0 : index
    %16 = vector.load %arg7[%c0_14, %c0_15] : memref<1x128xf32, #tpu.memory_space<vmem>>, vector<1x128xf32>
    %cst_16 = arith.constant dense<0.000000e+00> : vector<16x128xf32>
    %17 = tpu.matmul %14, %15, %cst_16 {dimension_numbers = #tpu.dot_dimension_numbers<[1], [0], [0], [1], [0, 0, 1, 1], [], []>} : vector<16x128xf32>, vector<128x128xf32>, vector<16x128xf32> -> vector<16x128xf32>
    %18 = vector.broadcast %16 : vector<1x128xf32> to vector<16x128xf32>
    %19 = arith.addf %17, %18 : vector<16x128xf32>
    %c0_17 = arith.constant 0 : index
    %c0_18 = arith.constant 0 : index
    %20 = vector.load %arg8[%c0_17, %c0_18] : memref<16x128xf32, #tpu.memory_space<vmem>>, vector<16x128xf32>
    tpu.vector_store %arg8[%c0_17, %c0_18], %19 {strides = array<i32>} : memref<16x128xf32, #tpu.memory_space<vmem>>, vector<16x128xf32>,
    return
  }
  func.func @transform_0(%arg0: i32) -> (i32, i32) {
    %c0_i32 = arith.constant 0 : i32
    %c0_i32_0 = arith.constant 0 : i32
    return %arg0, %c0_i32 : i32, i32
  }
  func.func @transform_1(%arg0: i32) -> (i32, i32) {
    %c0_i32 = arith.constant 0 : i32
    %c0_i32_0 = arith.constant 0 : i32
    %c0_i32_1 = arith.constant 0 : i32
    return %c0_i32, %c0_i32_0 : i32, i32
  }
  func.func @transform_2(%arg0: i32) -> (i32, i32) {
    %c0_i32 = arith.constant 0 : i32
    %c0_i32_0 = arith.constant 0 : i32
    %c0_i32_1 = arith.constant 0 : i32
    return %c0_i32, %c0_i32_0 : i32, i32
  }
  func.func @transform_3(%arg0: i32) -> (i32, i32) {
    %c0_i32 = arith.constant 0 : i32
    %c0_i32_0 = arith.constant 0 : i32
    %c0_i32_1 = arith.constant 0 : i32
    return %c0_i32, %c0_i32_0 : i32, i32
  }
  func.func @transform_4(%arg0: i32) -> (i32, i32) {
    %c0_i32 = arith.constant 0 : i32
    %c0_i32_0 = arith.constant 0 : i32
    %c0_i32_1 = arith.constant 0 : i32
    return %c0_i32, %c0_i32_0 : i32, i32
  }
  func.func @transform_5(%arg0: i32) -> (i32, i32) {
    %c0_i32 = arith.constant 0 : i32
    %c0_i32_0 = arith.constant 0 : i32
    %c0_i32_1 = arith.constant 0 : i32
    return %c0_i32, %c0_i32_0 : i32, i32
  }
  func.func @transform_6(%arg0: i32) -> (i32, i32) {
    %c0_i32 = arith.constant 0 : i32
    %c0_i32_0 = arith.constant 0 : i32
    %c0_i32_1 = arith.constant 0 : i32
    return %c0_i32, %c0_i32_0 : i32, i32
  }
  func.func @transform_7(%arg0: i32) -> (i32, i32) {
    %c0_i32 = arith.constant 0 : i32
    %c0_i32_0 = arith.constant 0 : i32
    return %arg0, %c0_i32 : i32, i32
  }
}

</mosaic_0001>

<bundles_post_ra>
// kernel: mlp_forward.1
= control target key start
LH: loop header
LB: loop body
LE: loop exit
PB: predicated region body
PF: predicated region fallthrough
CT: control target
= control target key end

     0   :  { %s844_s0 = inlined_call_operand.vmem [shape: f32[16,128], index: 0, kind: input, shape index: {}]   ;;  %s845_s1 = inlined_call_operand.vmem [shape: f32[128,128], index: 1, kind: input, shape index: {}]   ;;  %s846_s2 = inlined_call_operand.vmem [shape: f32[1,128], index: 2, kind: input, shape index: {}]   ;;  %s847_s3 = inlined_call_operand.vmem [shape: f32[128,128], index: 3, kind: input, shape index: {}]   ;;  %s848_s4 = inlined_call_operand.vmem [shape: f32[1,128], index: 4, kind: input, shape index: {}]   ;;  %s849_s5 = inlined_call_operand.vmem [shape: f32[128,128], index: 5, kind: input, shape index: {}]   ;;  %s850_s6 = inlined_call_operand.vmem [shape: f32[1,128], index: 6, kind: input, shape index: {}]   ;;  %s851_s7 = inlined_call_operand.hbm [shape: f32[16,128], index: 7, kind: output, shape index: {}]  }
   0x1   :  { %v29_v0 = vld [vmem:[%s845_s1] sm:$0xff]  ;;  %v30_v1 = vld [vmem:[%s845_s1 + $0x8] sm:$0xff]  ;;  %v31_v2 = vld [vmem:[%s845_s1 + $0x10] sm:$0xff] }
   0x2   :  { %v507_v3 = vpack.c.bf16 %v30_v1, %v29_v0  ;;  %v32_v4 = vld [vmem:[%s845_s1 + $0x18] sm:$0xff]  ;;  %v33_v6 = vld [vmem:[%s845_s1 + $0x20] sm:$0xff]  ;;  %v34_v7 = vld [vmem:[%s845_s1 + $0x28] sm:$0xff] }
   0x3   :  { %v511_v5 = vpack.c.bf16 %v32_v4, %v31_v2  ;;  %v515_v8 = vpack.c.bf16 %v34_v7, %v33_v6  ;;  %v35_v9 = vld [vmem:[%s845_s1 + $0x30] sm:$0xff]  ;;  %v36_v10 = vld [vmem:[%s845_s1 + $0x38] sm:$0xff]  ;;  %v27_v11 = vld [vmem:[%s844_s0] sm:$0xff] }
   0x4   :  { %508 = vmatprep.subr.bf16.mxu0 %v507_v3  ;;  %434 = vmatprep.mubr.f32.mxu0 %v27_v11  ;;  %v129_v12 = vld [vmem:[%s847_s3] sm:$0xff]  ;;  %v130_v13 = vld [vmem:[%s847_s3 + $0x8] sm:$0xff]  ;;  %v131_v14 = vld [vmem:[%s847_s3 + $0x10] sm:$0xff]  ;;  %v519_v20 = vpack.c.bf16 %v36_v10, %v35_v9 }
   0x5   :  { %510 = vmatpush3.bf16.msra.mxu0 %v507_v3  ;;  %v539_v15 = vpack.c.bf16 %v130_v13, %v129_v12  ;;  %v132_v16 = vld [vmem:[%s847_s3 + $0x18] sm:$0xff]  ;;  %v133_v18 = vld [vmem:[%s847_s3 + $0x20] sm:$0xff]  ;;  %v134_v19 = vld [vmem:[%s847_s3 + $0x28] sm:$0xff] }
   0x6   :  { %512 = vmatprep.subr.bf16.mxu0 %v511_v5  ;;  %v543_v17 = vpack.c.bf16 %v132_v16, %v131_v14  ;;  %v37_v21 = vld [vmem:[%s845_s1 + $0x40] sm:$0xff]  ;;  %v38_v22 = vld [vmem:[%s845_s1 + $0x48] sm:$0xff] }
   0x7   :  { %540 = vmatprep.subr.bf16.mxu1 %v539_v15 }
   0x8   :  { %542 = vmatpush3.bf16.msra.mxu1 %v539_v15 }
   0x9   :  { %514 = vmatpush3.bf16.msra.mxu0 %v511_v5 }
   0xa   :  { %516 = vmatprep.subr.bf16.mxu0 %v515_v8 }
   0xb   :  { %12 = vsyncpa [#allocation3], 0  ;;  %544 = vmatprep.subr.bf16.mxu1 %v543_v17  ;;  %v547_v23 = vpack.c.bf16 %v134_v19, %v133_v18  ;;  %v135_v24 = vld [vmem:[%s847_s3 + $0x30] sm:$0xff]  ;;  %v136_v25 = vld [vmem:[%s847_s3 + $0x38] sm:$0xff]  ;;  %v523_v26 = vpack.c.bf16 %v38_v22, %v37_v21 }
   0xc   :  { %v39_v27 = vld [vmem:[%s845_s1 + $0x50] sm:$0xff]  ;;  %v40_v28 = vld [vmem:[%s845_s1 + $0x58] sm:$0xff]  ;;  %546 = vmatpush3.bf16.msra.mxu1 %v543_v17  ;;  %v551_v29 = vpack.c.bf16 %v136_v25, %v135_v24  ;;  %v137_v30 = vld [vmem:[%s847_s3 + $0x40] sm:$0xff] }
   0xd   :  { %518 = vmatpush3.bf16.msra.mxu0 %v515_v8  ;;  %548 = vmatprep.subr.bf16.mxu1 %v547_v23  ;;  %v138_v31 = vld [vmem:[%s847_s3 + $0x48] sm:$0xff]  ;;  %v527_v32 = vpack.c.bf16 %v40_v28, %v39_v27  ;;  %v41_v33 = vld [vmem:[%s845_s1 + $0x60] sm:$0xff]  ;;  %v139_v36 = vld [vmem:[%s847_s3 + $0x50] sm:$0xff] }
   0xe   :  { %520 = vmatprep.subr.bf16.mxu0 %v519_v20  ;;  %v42_v34 = vld [vmem:[%s845_s1 + $0x68] sm:$0xff]  ;;  %v555_v35 = vpack.c.bf16 %v138_v31, %v137_v30  ;;  %v140_v37 = vld [vmem:[%s847_s3 + $0x58] sm:$0xff]  ;;  %v43_v39 = vld [vmem:[%s845_s1 + $0x70] sm:$0xff] }
   0xf   :  { %v531_v38 = vpack.c.bf16 %v42_v34, %v41_v33  ;;  %v44_v40 = vld [vmem:[%s845_s1 + $0x78] sm:$0xff]  ;;  %v559_v41 = vpack.c.bf16 %v140_v37, %v139_v36  ;;  %v141_v42 = vld [vmem:[%s847_s3 + $0x60] sm:$0xff]  ;;  %v142_v43 = vld [vmem:[%s847_s3 + $0x68] sm:$0xff] }
  0x10   :  { %550 = vmatpush3.bf16.msra.mxu1 %v547_v23  ;;  %v535_v44 = vpack.c.bf16 %v44_v40, %v43_v39  ;;  %v563_v45 = vpack.c.bf16 %v142_v43, %v141_v42  ;;  %v28_v46 = vld [vmem:[%s844_s0 + $0x8] sm:$0xff]  ;;  %v143_v47 = vld [vmem:[%s847_s3 + $0x70] sm:$0xff]  ;;  %v144_v48 = vld [vmem:[%s847_s3 + $0x78] sm:$0xff] }
  0x11   :  { %522 = vmatpush3.bf16.msra.mxu0 %v519_v20  ;;  %552 = vmatprep.subr.bf16.mxu1 %v551_v29  ;;  %v567_v49 = vpack.c.bf16 %v144_v48, %v143_v47  ;;  %v229_v50 = vld [vmem:[%s849_s5] sm:$0xff]  ;;  %v230_v51 = vld [vmem:[%s849_s5 + $0x8] sm:$0xff]  ;;  %v231_v52 = vld [vmem:[%s849_s5 + $0x10] sm:$0xff] }
  0x12   :  { %524 = vmatprep.subr.bf16.mxu0 %v523_v26  ;;  %v571_v53 = vpack.c.bf16 %v230_v51, %v229_v50  ;;  %v232_v54 = vld [vmem:[%s849_s5 + $0x18] sm:$0xff]  ;;  %v233_v56 = vld [vmem:[%s849_s5 + $0x20] sm:$0xff]  ;;  %v234_v57 = vld [vmem:[%s849_s5 + $0x28] sm:$0xff] }
  0x13   :  { %v575_v55 = vpack.c.bf16 %v232_v54, %v231_v52  ;;  %v579_v58 = vpack.c.bf16 %v234_v57, %v233_v56  ;;  %v235_v59 = vld [vmem:[%s849_s5 + $0x30] sm:$0xff]  ;;  %v236_v60 = vld [vmem:[%s849_s5 + $0x38] sm:$0xff]  ;;  %v237_v62 = vld [vmem:[%s849_s5 + $0x40] sm:$0xff] }
  0x14   :  { %554 = vmatpush3.bf16.msra.mxu1 %v551_v29  ;;  %v583_v61 = vpack.c.bf16 %v236_v60, %v235_v59  ;;  %v238_v63 = vld [vmem:[%s849_s5 + $0x48] sm:$0xff]  ;;  %v239_v1 = vld [vmem:[%s849_s5 + $0x50] sm:$0xff]  ;;  %v240_v2 = vld [vmem:[%s849_s5 + $0x58] sm:$0xff] }
  0x15   :  { %526 = vmatpush3.bf16.msra.mxu0 %v523_v26  ;;  %556 = vmatprep.subr.bf16.mxu1 %v555_v35  ;;  %v587_v0 = vpack.c.bf16 %v238_v63, %v237_v62  ;;  %v591_v3 = vpack.c.bf16 %v240_v2, %v239_v1  ;;  %v241_v4 = vld [vmem:[%s849_s5 + $0x60] sm:$0xff]  ;;  %v242_v5 = vld [vmem:[%s849_s5 + $0x68] sm:$0xff]  ;;  %v243_v14 = vld [vmem:[%s849_s5 + $0x70] sm:$0xff] }
  0x16   :  { %528 = vmatprep.subr.bf16.mxu0 %v527_v32  ;;  %v595_v6 = vpack.c.bf16 %v242_v5, %v241_v4  ;;  %v345_v7 = vld [vmem:[%s846_s2] ss:$0 sm:$0xff]  ;;  %v244_v15 = vld [vmem:[%s849_s5 + $0x78] sm:$0xff]  ;;  %s630_s5 = smov [#allocation2]  }
  0x17   :  { %v599_v16 = vpack.c.bf16 %v244_v15, %v243_v14  ;;  %v346_v17 = vld [vmem:[%s848_s4] ss:$0 sm:$0xff]  ;;  %s334_s8 = sshll.u32 %s630_s5, 4  ;;  %s335_s8 = int_to_ptr.vmem [resolvable:$true] %s334_s8 }
  0x18   :  { %558 = vmatpush3.bf16.msra.mxu1 %v555_v35  ;;  %v347_v24 = vld [vmem:[%s850_s6] ss:$0 sm:$0xff]  ;;  %s606_s4 = scalar_lea.vmem %s335_s8, 256  ;;  %p611_p1 = scmp.lt.s32.totalorder %s335_s8, %s335_s8 }
  0x19   :  { %530 = vmatpush3.bf16.msra.mxu0 %v527_v32  ;;  %560 = vmatprep.subr.bf16.mxu1 %v559_v41  ;;  %p607_p0 = scmp.ne.s32.totalorder %s335_s8, %s606_s4  ;;  %p612_p2 = scmp.lt.s32.totalorder %s606_s4, %s606_s4 }
  0x1a   :  { %532 = vmatprep.subr.bf16.mxu0 %v531_v38 }
  0x1b   :  { %p613_p3 = por %p612_p2, %p611_p1 }
  0x1c   :  { %562 = vmatpush3.bf16.msra.mxu1 %v559_v41 }
  0x1d   :  { %534 = vmatpush3.bf16.msra.mxu0 %v531_v38  ;;  %564 = vmatprep.subr.bf16.mxu1 %v563_v45  ;;  %p614_p4 = pnand %p613_p3, %p607_p0 }
  0x1e   :  { %536 = vmatprep.subr.bf16.mxu0 %v535_v44 }
  0x20   :  { %566 = vmatpush3.bf16.msra.mxu1 %v563_v45 }
  0x21   :  { %538 = vmatpush3.bf16.msra.mxu0 %v535_v44  ;;  %568 = vmatprep.subr.bf16.mxu1 %v567_v49 }
  0x22   :  { %572 = vmatprep.subr.bf16.mxu0 %v571_v53 }
  0x24   :  { %435 = vmatmul.mubr.f32.vlgmr.msra.gmra.mrb[0].mxu0 %v28_v46  ;;  %570 = vmatpush3.bf16.msra.mxu1 %v567_v49 }
  0x25   :  { %574 = vmatpush3.bf16.msra.mxu0 %v571_v53 }
  0x26   :  { %576 = vmatprep.subr.bf16.mxu0 %v575_v55 }
  0x29   :  { %578 = vmatpush3.bf16.msra.mxu0 %v575_v55 }
  0x2a   :  { %580 = vmatprep.subr.bf16.mxu0 %v579_v58 }
  0x2d   :  { %582 = vmatpush3.bf16.msra.mxu0 %v579_v58 }
  0x2e   :  { %584 = vmatprep.subr.bf16.mxu0 %v583_v61 }
  0x31   :  { %586 = vmatpush3.bf16.msra.mxu0 %v583_v61 }
  0x32   :  { %588 = vmatprep.subr.bf16.mxu0 %v587_v0 }
  0x35   :  { %590 = vmatpush3.bf16.msra.mxu0 %v587_v0 }
  0x36   :  { %592 = vmatprep.subr.bf16.mxu0 %v591_v3 }
  0x39   :  { %594 = vmatpush3.bf16.msra.mxu0 %v591_v3 }
  0x3a   :  { %596 = vmatprep.subr.bf16.mxu0 %v595_v6 }
  0x3d   :  { %598 = vmatpush3.bf16.msra.mxu0 %v595_v6 }
  0x3e   :  { %600 = vmatprep.subr.bf16.mxu0 %v599_v16 }
  0x41   :  { %602 = vmatpush3.bf16.msra.mxu0 %v599_v16 }
  0xf7   :  { %v436_v8 = vpop.f32.mrb[0].mxu0 }
  0xf8   :  { %v124_v9 = vadd.f32 %v436_v8, %v345_v7  ;;  %v118_v10 = vpop.f32.mrb[1].mxu0 }
  0xf9   :  { %v119_v11 = vadd.f32 %v345_v7, %v118_v10 }
  0xfa   :  { %v128_v13 = vmax.f32 %v124_v9, 0.0 }
  0xfb   :  { %v127_v12 = vmax.f32 %v119_v11, 0.0 }
  0xfd   :  { %469 = vmatprep.mubr.f32.mxu1 %v127_v12 }
  0xfe   :  { %470 = vmatmul.mubr.f32.vlgmr.msra.gmra.mrb[0].mxu1 %v128_v13 }
 0x1d1   :  { %v471_v18 = vpop.f32.mrb[0].mxu1 }
 0x1d2   :  { %v224_v19 = vadd.f32 %v471_v18, %v346_v17  ;;  %v218_v20 = vpop.f32.mrb[1].mxu1 }
 0x1d3   :  { %v219_v21 = vadd.f32 %v346_v17, %v218_v20 }
 0x1d4   :  { %v228_v23 = vmax.f32 %v224_v19, 0.0 }
 0x1d5   :  { %v227_v22 = vmax.f32 %v219_v21, 0.0 }
 0x1d7   :  { %504 = vmatprep.mubr.f32.mxu0 %v227_v22 }
 0x1d8   :  { %505 = vmatmul.mubr.f32.vlgmr.msra.gmra.mrb[2].mxu0 %v228_v23 }
 0x2ab   :  { %v506_v25 = vpop.f32.mrb[2].mxu0 }
 0x2ac   :  { %v324_v26 = vadd.f32 %v506_v25, %v347_v24  ;;  %v318_v27 = vpop.f32.mrb[3].mxu0 }
 0x2ad   :  { %v319_v28 = vadd.f32 %v347_v24, %v318_v27 }
 0x2ae   :  { %328 = vst [vmem:[#allocation2 + $0x8] sm:$0xff] %v324_v26 }
 0x2af   :  { %327 = vst [vmem:[#allocation2] sm:$0xff] %v319_v28 }
 0x2b0   :  { %617 = shalt.err (!%p614_p4)
}
 0x2b1   :  { %s618_s6 = scalar_lea.hbm %s851_s7, 256 }
 0x2b2   :  { %p619_p5 = scmp.ne.s32.totalorder %s851_s7, %s618_s6  ;;  %p622_p6 = scmp.lt.u32.totalorder %s618_s6, %s851_s7 }
 0x2b4   :  { %p624_p7 = pnand %p622_p6, %p619_p5 }
 0x2b6   :  { %627 = shalt.err (!%p624_p7)
}
 0x2b7   :  { %s631_s15 = smov 128   ;;  %s632_s16 = smov 8  }
 0x2b8   :  { %340 = dma.vmem_to_hbm [thread:$0]  %s335_s8, 256, %s851_s7, [#allocation3], %s631_s15, %s631_s15, %s632_s16  }
 0x2b9   :  { %628 = dma.done.wait [#allocation3], 256  }
 0x2ba   :  { %629 = vsyncadd [#allocation3], 4294967040 }
 0x2bb   :  { %344 = vsyncpa [#allocation3], 1 }

</bundles_post_ra>
